<compile_context>
chip_gen: v7x
topology: tpu7x:2x2x1
jax: 0.10.0
libtpu: 0.0.40
codegen_flags: <defaults>
</compile_context>

<pallas_src>
import functools
import math

import jax
import jax.numpy as jnp
from jax import lax
from jax.experimental import pallas as pl
from jax.experimental.pallas import tpu as pltpu


def _layernorm_kernel(x_ref, w_ref, b_ref, o_ref, *, eps: float):
    # x_ref: (R, D)   w_ref/b_ref: (1, D)   o_ref: (R, D)
    x = x_ref[...].astype(jnp.float32)
    d_inv = 1.0 / float(x_ref.shape[-1])
    mean = jnp.sum(x, axis=-1, keepdims=True) * d_inv              # (R, 1)
    mean_sq = jnp.sum(x * x, axis=-1, keepdims=True) * d_inv       # (R, 1)
    var = jnp.maximum(mean_sq - mean * mean, 0.0)                  # biased var
    inv = lax.rsqrt(var + eps)                                     # EUP (free slot)
    w = w_ref[...].astype(jnp.float32)                             # (1, D)
    b = b_ref[...].astype(jnp.float32)                             # (1, D)
    scale = inv * w                                                # (R, D)
    shift = b - mean * scale                                       # (R, D)
    o_ref[...] = (x * scale + shift).astype(o_ref.dtype)


def _round_up(x: int, m: int) -> int:
    return -(-x // m) * m


@functools.lru_cache(maxsize=None)
def _vmem_budgets():
    """(working_budget, vmem_limit_bytes, max_input_block_bytes), generation-aware."""
    vmem_cap = 64 << 20  # conservative default (v7x-sized) if the query fails
    try:
        vmem_cap = int(getattr(pltpu.get_tpu_info(), "vmem_capacity_bytes", vmem_cap))
    except Exception:
        pass
    if vmem_cap > (64 << 20):               # 128 MiB parts: v5e / v6e
        return 56 << 20, 96 << 20, 16 << 20
    return 20 << 20, 44 << 20, 8 << 20      # 64 MiB parts: v7x


def _choose_row_tile(n_rows: int, d: int, in_bytes: int, out_bytes: int,
                     row_align: int, *, work_budget: int,
                     max_block_bytes: int) -> int:
    """Largest row tile (multiple of row_align) whose *full* VMEM footprint
    (double-buffered in/out tiles + ~3 f32 body temporaries) fits the budget,
    capped bytes-wise and so the grid keeps >= 2 balanced steps."""
    per_row = d * (2 * (in_bytes + out_bytes) + 3 * 4)
    by_budget = max(row_align, (work_budget // per_row) // row_align * row_align)
    by_block = max(row_align, (max_block_bytes // (d * in_bytes)) // row_align * row_align)
    tile = min(by_budget, by_block)
    tile = min(tile, _round_up(max(n_rows, 1), row_align))     # don't exceed problem
    # Keep >= 2 (balanced) grid steps so the row axis can shard across the two
    # TensorCores on v7x megacore parts; costs one ~0.35us step elsewhere.
    if n_rows >= 2 * row_align:
        tile = min(tile, _round_up((n_rows + 1) // 2, row_align))
    return max(row_align, tile)


def layernorm(x: jax.Array, w: jax.Array, b: jax.Array, *, eps: float = 1e-5) -> jax.Array:
    """x: [..., length]; w, b: [length]. Returns LayerNorm(x) in w.dtype (cfg.dtype)."""
    orig_shape = x.shape
    d = orig_shape[-1]
    assert w.shape == (d,) and b.shape == (d,)

    n_rows = math.prod(orig_shape[:-1])
    x2 = x.reshape(n_rows, d)

    out_dtype = w.dtype
    in_bytes = x.dtype.itemsize
    out_bytes = jnp.dtype(out_dtype).itemsize
    # Sublane packing of the narrowest I/O dtype: 8 (f32), 16 (bf16), 32 (int8).
    row_align = min(32, 32 // min(in_bytes, out_bytes, 4))

    work_budget, vmem_limit, max_block = _vmem_budgets()
    tile = _choose_row_tile(n_rows, d, in_bytes, out_bytes, row_align,
                            work_budget=work_budget, max_block_bytes=max_block)
    grid = (pl.cdiv(n_rows, tile),)

    out = pl.pallas_call(
        functools.partial(_layernorm_kernel, eps=float(eps)),
        out_shape=jax.ShapeDtypeStruct((n_rows, d), out_dtype),
        grid_spec=pltpu.PrefetchScalarGridSpec(
            num_scalar_prefetch=0,
            grid=grid,
            in_specs=[
                pl.BlockSpec((tile, d), lambda i: (i, 0)),   # activations, row-tiled
                pl.BlockSpec((1, d), lambda i: (0, 0)),      # w, resident in VMEM
                pl.BlockSpec((1, d), lambda i: (0, 0)),      # b, resident in VMEM
            ],
            out_specs=pl.BlockSpec((tile, d), lambda i: (i, 0)),
        ),
        compiler_params=pltpu.CompilerParams(
            dimension_semantics=("parallel",),
            vmem_limit_bytes=vmem_limit,
        ),
    )(x2, w.reshape(1, d), b.reshape(1, d))

    return out.reshape(orig_shape)


def _layernorm_ref(x, w, b, eps):
    x32 = x.astype(jnp.float32)
    xc = x32 - x32.mean(-1, keepdims=True)
    scale = jnp.sqrt((xc * xc).mean(-1, keepdims=True) + eps)
    y = xc / scale
    return (y * w.astype(jnp.float32) + b.astype(jnp.float32)).astype(w.dtype)


if __name__ == "__main__":
    # NOTE: hook_scale / hook_normalized are identity HookPoints in forward —
    # they have no computational effect and are not reproduced here.
    key = jax.random.PRNGKey(0)
    kx, kw, kb = jax.random.split(key, 3)

    batch, pos, d_model = 2, 8, 128
    eps = 1e-5

    x = jax.random.normal(kx, (batch, pos, d_model), dtype=jnp.float32)
    w = 1.0 + 0.1 * jax.random.normal(kw, (d_model,), dtype=jnp.float32)
    b = 0.1 * jax.random.normal(kb, (d_model,), dtype=jnp.float32)

    # f32 path (row tile split into 2 grid steps -> exercises multi-step grid)
    out = jax.block_until_ready(layernorm(x, w, b, eps=eps))
    ref = _layernorm_ref(x, w, b, eps)
    assert out.shape == x.shape and out.dtype == jnp.float32
    assert jnp.allclose(out, ref, atol=1e-5, rtol=1e-5), "f32 mismatch vs reference"

    # bf16 params / input (module casts to f32 internally, returns cfg.dtype)
    xb, wb, bb = x.astype(jnp.bfloat16), w.astype(jnp.bfloat16), b.astype(jnp.bfloat16)
    outb = jax.block_until_ready(layernorm(xb, wb, bb, eps=eps))
    refb = _layernorm_ref(xb, wb, bb, eps)
    assert outb.dtype == jnp.bfloat16
    assert jnp.allclose(outb.astype(jnp.float32), refb.astype(jnp.float32),
                        atol=3e-2, rtol=3e-2), "bf16 mismatch vs reference"

    # 4-D [batch, pos, head_index, d_head] path also supported by the wrapper
    x4 = jax.random.normal(kx, (2, 4, 2, d_model), dtype=jnp.float32)
    out4 = jax.block_until_ready(layernorm(x4, w, b, eps=eps))
    ref4 = _layernorm_ref(x4, w, b, eps)
    assert jnp.allclose(out4, ref4, atol=1e-5, rtol=1e-5), "4-D mismatch vs reference"

    # Ragged row count: exercises the masked partial last block (no jnp.pad/slice)
    xr = jax.random.normal(kx, (3, 5, d_model), dtype=jnp.float32)
    outr = jax.block_until_ready(layernorm(xr, w, b, eps=eps))
    refr = _layernorm_ref(xr, w, b, eps)
    assert jnp.allclose(outr, refr, atol=1e-5, rtol=1e-5), "ragged mismatch vs reference"

    print("KERNEL_OK")
</pallas_src>

<mosaic_0001>
module attributes {stable_mosaic.version = 11 : i64} {
  func.func @_layernorm_kernel(%arg0: i32, %arg1: memref<8x128xf32, #tpu.memory_space<vmem>>, %arg2: memref<1x128xf32, #tpu.memory_space<vmem>>, %arg3: memref<1x128xf32, #tpu.memory_space<vmem>>, %arg4: memref<8x128xf32, #tpu.memory_space<vmem>>) attributes {dimension_semantics = [#tpu.dimension_semantics<parallel>], iteration_bounds = array<i64: 2>, scalar_prefetch = 0 : i64, scratch_operands = 0 : i64, tpu.core_type = #tpu.core_type<tc>, window_params = [{transform_indices = @transform_0, window_bounds = array<i64: 8, 128>}, {pipeline_mode = #tpu.pipeline_mode<synchronous>, transform_indices = @transform_1, window_bounds = array<i64: 1, 128>}, {pipeline_mode = #tpu.pipeline_mode<synchronous>, transform_indices = @transform_2, window_bounds = array<i64: 1, 128>}, {transform_indices = @transform_3, window_bounds = array<i64: 8, 128>}]} {
    %c0 = arith.constant 0 : index
    %c0_0 = arith.constant 0 : index
    %0 = vector.load %arg1[%c0, %c0_0] : memref<8x128xf32, #tpu.memory_space<vmem>>, vector<8x128xf32>
    %cst = arith.constant dense<0.000000e+00> : vector<8xf32>
    %1 = vector.multi_reduction <add>, %0, %cst [1] : vector<8x128xf32> to vector<8xf32>
    %2 = vector.shape_cast %1 : vector<8xf32> to vector<8x1xf32>
    %cst_1 = arith.constant 7.812500e-03 : f32
    %3 = vector.broadcast %cst_1 : f32 to vector<8x1xf32>
    %4 = arith.mulf %2, %3 : vector<8x1xf32>
    %5 = arith.mulf %0, %0 : vector<8x128xf32>
    %cst_2 = arith.constant dense<0.000000e+00> : vector<8xf32>
    %6 = vector.multi_reduction <add>, %5, %cst_2 [1] : vector<8x128xf32> to vector<8xf32>
    %7 = vector.shape_cast %6 : vector<8xf32> to vector<8x1xf32>
    %cst_3 = arith.constant 7.812500e-03 : f32
    %8 = vector.broadcast %cst_3 : f32 to vector<8x1xf32>
    %9 = arith.mulf %7, %8 : vector<8x1xf32>
    %10 = arith.mulf %4, %4 : vector<8x1xf32>
    %11 = arith.subf %9, %10 : vector<8x1xf32>
    %cst_4 = arith.constant 0.000000e+00 : f32
    %12 = vector.broadcast %cst_4 : f32 to vector<8x1xf32>
    %13 = arith.maximumf %11, %12 : vector<8x1xf32>
    %cst_5 = arith.constant 9.99999974E-6 : f32
    %14 = vector.broadcast %cst_5 : f32 to vector<8x1xf32>
    %15 = arith.addf %13, %14 : vector<8x1xf32>
    %16 = math.rsqrt %15 : vector<8x1xf32>
    %c0_6 = arith.constant 0 : index
    %c0_7 = arith.constant 0 : index
    %17 = vector.load %arg2[%c0_6, %c0_7] : memref<1x128xf32, #tpu.memory_space<vmem>>, vector<1x128xf32>
    %c0_8 = arith.constant 0 : index
    %c0_9 = arith.constant 0 : index
    %18 = vector.load %arg3[%c0_8, %c0_9] : memref<1x128xf32, #tpu.memory_space<vmem>>, vector<1x128xf32>
    %19 = vector.broadcast %16 : vector<8x1xf32> to vector<8x128xf32>
    %20 = vector.broadcast %17 : vector<1x128xf32> to vector<8x128xf32>
    %21 = arith.mulf %19, %20 : vector<8x128xf32>
    %22 = vector.broadcast %4 : vector<8x1xf32> to vector<8x128xf32>
    %23 = arith.mulf %22, %21 : vector<8x128xf32>
    %24 = vector.broadcast %18 : vector<1x128xf32> to vector<8x128xf32>
    %25 = arith.subf %24, %23 : vector<8x128xf32>
    %26 = arith.mulf %0, %21 : vector<8x128xf32>
    %27 = arith.addf %26, %25 : vector<8x128xf32>
    %c0_10 = arith.constant 0 : index
    %c0_11 = arith.constant 0 : index
    %28 = vector.load %arg4[%c0_10, %c0_11] : memref<8x128xf32, #tpu.memory_space<vmem>>, vector<8x128xf32>
    tpu.vector_store %arg4[%c0_10, %c0_11], %27 {strides = array<i32>} : memref<8x128xf32, #tpu.memory_space<vmem>>, vector<8x128xf32>,
    return
  }
  func.func @transform_0(%arg0: i32) -> (i32, i32) {
    %c0_i32 = arith.constant 0 : i32
    %c0_i32_0 = arith.constant 0 : i32
    return %arg0, %c0_i32 : i32, i32
  }
  func.func @transform_1(%arg0: i32) -> (i32, i32) {
    %c0_i32 = arith.constant 0 : i32
    %c0_i32_0 = arith.constant 0 : i32
    %c0_i32_1 = arith.constant 0 : i32
    return %c0_i32, %c0_i32_0 : i32, i32
  }
  func.func @transform_2(%arg0: i32) -> (i32, i32) {
    %c0_i32 = arith.constant 0 : i32
    %c0_i32_0 = arith.constant 0 : i32
    %c0_i32_1 = arith.constant 0 : i32
    return %c0_i32, %c0_i32_0 : i32, i32
  }
  func.func @transform_3(%arg0: i32) -> (i32, i32) {
    %c0_i32 = arith.constant 0 : i32
    %c0_i32_0 = arith.constant 0 : i32
    return %arg0, %c0_i32 : i32, i32
  }
}

</mosaic_0001>

<bundles_post_ra>
// kernel: tpu_custom_call.1
= control target key start
LH: loop header
LB: loop body
LE: loop exit
PB: predicated region body
PF: predicated region fallthrough
CT: control target
= control target key end

     0   :  { %8 = vsyncpa [#allocation3], 0  ;;  %s652_s0 = inlined_call_operand.hbm [shape: f32[16,128], index: 0, kind: input, shape index: {}]   ;;  %s653_s1 = inlined_call_operand.vmem [shape: f32[1,128], index: 1, kind: input, shape index: {}]   ;;  %s654_s2 = inlined_call_operand.vmem [shape: f32[1,128], index: 2, kind: input, shape index: {}]   ;;  %s655_s3 = inlined_call_operand.hbm [shape: f32[16,128], index: 3, kind: output, shape index: {}]  }
   0x1   :  { %10 = vsyncpa [#allocation3 + $0x1], 0 }
   0x2   :  { %11 = vsyncpa [#allocation4], 0 }
   0x3   :  { %13 = vsyncpa [#allocation4 + $0x1], 0  ;;  %s485_s12 = smov 0   ;;  %s487_s13 = smov 0  }
   0x4   :  { %s489_s14 = smov 0   ;;  %s491_s15 = smov 0  }
   0x5 LB: > { %s506_s16 = sadd.s32 4294967295, %s461_s15   ;;  %s303_s17 = sadd.s32 4294967294, %s461_s15   ;;  %s461_s15 = sphi %s491_s15, %s670_s15   ;;  %s457_s14 = sphi %s489_s14, %s669_s14   ;;  %s453_s13 = sphi %s487_s13, %s668_s13   ;;  %s449_s12 = sphi %s485_s12, %s667_s12  }
   0x6   : > { %s510_s18 = sadd.s32 1, %s461_s15   ;;  %s26_s19 = sadd.s32 1, %s457_s14 }
   0x7   : > { %s23_s20 = ssub.s32 %s461_s15, %s510_s18  ;;  %p33_p0 = scmp.ne.s32.totalorder %s457_s14, %s453_s13 }
   0x8   : > { %p24_p1 = scmp.eq.s32.totalorder %s23_s20, 0  ;;  %p34_p2 = scmp.eq.s32.totalorder %s461_s15, 0 }
   0x9   : > { %p39_p3 = scmp.ne.s32.totalorder %s453_s13, %s449_s12  ;;  %p40_p4 = scmp.eq.s32.totalorder %s506_s16, 0 }
   0xa   : > { %s522_s21 = scalar_select %p24_p1, %s457_s14, %s26_s19  }
   0xb   : > { %p524_p5 = por %p34_p2, %p33_p0  ;;  %p528_p6 = por %p40_p4, %p39_p3 }
   0xc   : > { %p105_p7 = scmp.eq.s32.totalorder %s506_s16, 1  ;;  %p111_p8 = scmp.eq.s32.totalorder %s303_s17, 1 }
   0xd   : > { %p329_p10 = scmp.lt.s32.totalorder %s461_s15, 2  ;;  %s137_s26 = sand.u32 1, %s457_s14  }
   0xe   : > { %p535_p11 = por %p105_p7, %p33_p0  ;;  %p539_p12 = por %p111_p8, %p39_p3 }
   0xf   : > { %s307_s27 = sshll.u32 %s461_s15, 7  ;;  %s306_s28 = sshll.u32 %s137_s26, 3 }
  0x10   : > { %s659_s24 = scalar_select %p535_p11, 1, 0 }
  0x11   : > { %s660_s25 = scalar_select %p539_p12, 1, 0 }
  0x12   : > { %s548_s4 = scalar_lea.hbm %s652_s0, %s307_s27  ;;  %s141_s5 = scalar_lea.vmem [#allocation2], %s306_s28 }
  0x13   : > { %s148_s6 = sshll.u32 %s141_s5, 4  ;;  %p552_p13 = pnand %p329_p10, %p524_p5  ;;  %s556_s6 = int_to_ptr.vmem [resolvable:$true] %s148_s6 }
  0x14   : > { %s138_s8 = scalar_lea.sflag [#allocation3], %s137_s26  ;;  %s365_s9 = scalar_lea.hbm %s548_s4, 128 }
  0x15   : > { %p366_p2 = scmp.ne.s32.totalorder %s548_s4, %s365_s9  ;;  %p367_p3 = pneg %p552_p13 }
  0x16   : > { %s370_s17 = scalar_lea.hbm %s652_s0, 256  ;;  %p371_p5 = scmp.lt.u32.totalorder %s548_s4, %s652_s0 }
  0x17   : > { %p368_p4 = pnand %p367_p3, %p366_p2  ;;  %p372_p8 = scmp.lt.u32.totalorder %s370_s17, %s365_s9 }
  0x18   : > { %p374_p9 = scmp.lt.u32.totalorder %s365_s9, %s548_s4 }
  0x19   : > { %p369_p7 = pneg %p368_p4  ;;  %p373_p10 = por %p372_p8, %p371_p5 }
  0x1b   : > { %p375_p0 = por %p374_p9, %p373_p10 }
  0x1d   : > { %p376_p1 = pnand %p375_p0, %p369_p7 }
  0x1f   : > { %379 = shalt.err (!%p376_p1)
}
  0x20   : > { %s380_s22 = scalar_lea.vmem %s556_s6, 128  ;;  %s463_s26 = smov [#allocation2]  }
  0x21   : > { %p381_p2 = scmp.ne.s32.totalorder %s556_s6, %s380_s22  ;;  %s385_s27 = sshll.u32 %s463_s26, 4  ;;  %s386_s27 = int_to_ptr.vmem [resolvable:$false] %s385_s27 }
  0x22   : > { %s387_s28 = scalar_lea.vmem %s386_s27, 256  ;;  %p388_p11 = scmp.lt.s32.totalorder %s556_s6, %s386_s27 }
  0x23   : > { %p383_p4 = pnand %p381_p2, %p367_p3  ;;  %p389_p5 = scmp.lt.s32.totalorder %s387_s28, %s380_s22 }
  0x25   : > { %p384_p12 = pneg %p383_p4  ;;  %p390_p8 = por %p389_p5, %p388_p11 }
  0x27   : > { %p391_p9 = pnand %p390_p8, %p384_p12 }
  0x29   : > { %394 = shalt.err (!%p391_p9)
}
  0x2a   : > { %324 = dma.hbm_to_vmem [thread:$0]  (!%p552_p13), %s548_s4, 128, %s556_s6, %s138_s8  }
  0x2b   : > { %p662_p0 = scmp.lt.s32.totalorder %s461_s15, 3  ;;  %p663_p1 = scmp.ge.s32.totalorder %s461_s15, 1 }
  0x2d   : > { %p154_p3 = pnand %p663_p1, %p662_p0 }
  0x2e   : > { %s590_s29 = sand.u32 (!%p154_p3), 1, %s453_s13  }
  0x2f   : > { %157 = sbr.rel (%p154_p3) target bundleno = 243 (0xf3), region = 32  ;;  %s309_s30 = sshll.u32 (!%p154_p3), %s590_s29, 3 }
  0x30   : > { %s160_s5 = scalar_lea.sflag (!%p154_p3), [#allocation3], %s590_s29  ;;  %s163_s9 = scalar_lea.vmem (!%p154_p3), [#allocation2], %s309_s30 }
  0x36   : > { %440 = dma.done.wait (%p528_p6), %s160_s5, 128  }
  0x37   : > { %442 = vsyncadd (%p528_p6), %s160_s5, 4294967168  ;;  %v186_v0 = vld [vmem:[%s163_s9] sm:$0xff]  ;;  %s314_s8 = sshll.u32 %s506_s16, 7  ;;  %s185_s10 = scalar_lea.vmem [#allocation5], %s309_s30 }
  0x38   : > { %187 = vadd.xlane.f32.xlu0 %v186_v0  ;;  %v190_v1 = vmul.f32 %v186_v0, %v186_v0  ;;  %v311_v10 = vld [vmem:[%s653_s1] ss:$0 sm:$0xff]  ;;  %s233_s11 = sshll.u32 %s185_s10, 4  ;;  %s608_s20 = scalar_lea.hbm %s655_s3, %s314_s8  ;;  %s610_s11 = int_to_ptr.vmem [resolvable:$true] %s233_s11 }
  0x39   : > { %v312_v13 = vld [vmem:[%s654_s2] ss:$0 sm:$0xff]  ;;  %s220_s22 = scalar_lea.sflag [#allocation4], %s590_s29  ;;  %s395_s26 = scalar_lea.vmem %s610_s11, 128 }
  0x3a   : > { %p396_p6 = scmp.ne.s32.totalorder %s610_s11, %s395_s26  ;;  %p664_p11 = scmp.ne.s32.totalorder %s659_s24, 0 }
  0x3b   : > { %s464_s16 = smov [#allocation5]  }
  0x3c   : > { %191 = vadd.xlane.f32.xlu0 %v190_v1  ;;  %p397_p12 = pnand %p396_p6, %p664_p11  ;;  %s399_s27 = sshll.u32 %s464_s16, 4  ;;  %s400_s27 = int_to_ptr.vmem [resolvable:$false] %s399_s27 }
  0x3d   : > { %s401_s28 = scalar_lea.vmem %s400_s27, 256  ;;  %p402_p7 = scmp.lt.s32.totalorder %s610_s11, %s400_s27 }
  0x3e   : > { %p398_p13 = pneg %p397_p12  ;;  %p403_p10 = scmp.lt.s32.totalorder %s401_s28, %s395_s26 }
  0x40   : > { %p404_p2 = por %p403_p10, %p402_p7 }
  0x42   : > { %p405_p4 = pnand %p404_p2, %p398_p13 }
  0xc5   : > { %v188_v2 = vpop.xlane.xlu0 %187 }
  0xc6   : > { %v189_v3 = vmul.f32 0.0078125, %v188_v2 }
  0xc8   : > { %v194_v5 = vmul.f32 %v189_v3, %v189_v3 }
  0xc9   : > { %v192_v4 = vpop.xlane.xlu0 %191 }
  0xca   : > { %v193_v6 = vmul.f32 0.0078125, %v192_v4 }
  0xcc   : > { %v195_v7 = vsub.f32 %v193_v6, %v194_v5 }
  0xce   : > { %v196_v8 = vmax.f32 %v195_v7, 0.0 }
  0xd0   : > { %v197_v9 = vadd.f32 1e-05, %v196_v8 }
  0xd2   : > { %363 = vrsqrt.f32 %v197_v9 }
  0xdc   : > { %v364_v11 = vpop.eup %363 }
  0xdd   : > { %v207_v12 = vmul.f32 %v364_v11, %v311_v10 }
  0xdf   : > { %v208_v14 = vmul.f32 %v207_v12, %v189_v3  ;;  %v216_v16 = vmul.f32 %v207_v12, %v186_v0 }
  0xe1   : > { %v215_v15 = vsub.f32 %v312_v13, %v208_v14 }
  0xe3   : > { %v217_v17 = vadd.f32 %v216_v16, %v215_v15 }
  0xe5   : > { %218 = vst [vmem:[%s185_s10] sm:$0xff] %v217_v17 }
  0xe6   : > { %408 = shalt.err (!%p405_p4)
}
  0xe7   : > { %s409_s29 = scalar_lea.hbm %s608_s20, 128  ;;  %s413_s9 = scalar_lea.hbm %s655_s3, 256 }
  0xe8   : > { %p410_p5 = scmp.ne.s32.totalorder %s608_s20, %s409_s29  ;;  %p414_p0 = scmp.lt.u32.totalorder %s608_s20, %s655_s3 }
  0xe9   : > { %p415_p1 = scmp.lt.u32.totalorder %s413_s9, %s409_s29  ;;  %p417_p6 = scmp.lt.u32.totalorder %s409_s29, %s608_s20 }
  0xea   : > { %p411_p8 = pnand %p410_p5, %p664_p11 }
  0xeb   : > { %p416_p3 = por %p415_p1, %p414_p0 }
  0xec   : > { %p412_p9 = pneg %p411_p8 }
  0xed   : > { %p418_p12 = por %p417_p6, %p416_p3 }
  0xef   : > { %p419_p13 = pnand %p418_p12, %p412_p9 }
  0xf1   : > { %422 = shalt.err (!%p419_p13)
}
  0xf2   : > { %319 = dma.vmem_to_hbm [thread:$0]  (%p664_p11), %s610_s11, 128, %s608_s20, %s220_s22  }
  0xf3 PF: > { %s245_s23 = sand.u32 1, %s449_s12   ;;  %p665_p7 = scmp.ne.s32.totalorder %s660_s25, 0 }
  0xf4   : > { %p666_p10 = scmp.ge.s32.totalorder %s461_s15, 2  ;;  %s246_s7 = scalar_lea.sflag [#allocation4], %s245_s23 }
  0xf6   : > { %p326_p2 = pnand %p666_p10, %p665_p7 }
  0xf8   : > { %444 = dma.done.wait (!%p326_p2), %s246_s7, 128  }
  0xf9   : > { %446 = vsyncadd (!%p326_p2), %s246_s7, 4294967168  ;;  %p16_p4 = scmp.ge.s32.totalorder %s510_s18, 4   ;;  %s667_s12 = smov %s453_s13 }
  0xfa   : > { %s668_s13 = smov %s457_s14  ;;  %s669_s14 = smov %s522_s21 }
  0xfb   : > { %s670_s15 = smov %s510_s18  ;;  %18 = sbr.rel (!%p16_p4) target bundleno = 5 (0x5), region = 77 }
 0x102   :  { %251 = vsyncpa [#allocation3], 1 }
 0x103   :  { %253 = vsyncpa [#allocation3 + $0x1], 1 }
 0x104   :  { %254 = vsyncpa [#allocation4], 1 }
 0x105   :  { %256 = vsyncpa [#allocation4 + $0x1], 1 }

</bundles_post_ra>
